<compile_context>
chip_gen: v7x
topology: tpu7x:2x2x1
jax: 0.10.0
libtpu: 0.0.40
codegen_flags: <defaults>
</compile_context>

<pallas_src>
import functools

import numpy as np
import jax
import jax.numpy as jnp
from jax.experimental import pallas as pl
from jax.experimental.pallas import tpu as pltpu


def _round_up(x, m):
    return ((x + m - 1) // m) * m


# ----------------------------------------------------------------------------
# Pallas kernel: one TM-row token tile of the full MLP forward pass
#   h1  = relu([feat|act] @ W1 + b1)
#   h2  = relu(h1 @ W2 + b2)
#   out = h2 @ Wo + bo
# ----------------------------------------------------------------------------
def forward_model_kernel(x_ref, w1_ref, b1_ref, w2_ref, b2_ref,
                         wo_ref, bo_ref, out_ref):
    # layer 1: fused [feat | act] contraction on the MXU (bf16 in, f32 acc)
    h = jnp.dot(x_ref[...], w1_ref[...], preferred_element_type=jnp.float32)
    h = jnp.maximum(h + b1_ref[...], 0.0)          # f32 VPU path

    # layer 2
    h = jnp.dot(h.astype(w2_ref.dtype), w2_ref[...],
                preferred_element_type=jnp.float32)
    h = jnp.maximum(h + b2_ref[...], 0.0)

    # output layer (no activation); lane-dense (128-wide) f32 store
    out = jnp.dot(h.astype(wo_ref.dtype), wo_ref[...],
                  preferred_element_type=jnp.float32)
    out_ref[...] = (out + bo_ref[...]).astype(out_ref.dtype)


# ----------------------------------------------------------------------------
# Wrapper: flatten (B, T) -> N, build one fused bf16 [feat|act] stream, tile
# the token axis, keep all weights resident, lane-dense padded output.
# ----------------------------------------------------------------------------
def forward_model_pallas(features, act, params, *, tm=2048):
    B, T, F = features.shape
    A = act.shape[-1]
    N = B * T

    w1, b1, w2, b2, wo, bo = params
    Kp, H1p = w1.shape            # K padded to multiple of 16
    H2p = w2.shape[1]
    Fop = wo.shape[1]             # feature_dim padded to 128 lanes

    # Fused, K-padded bf16 input stream: [feat | act | zeros].  One concat in
    # XLA replaces the old pad+astype round trip and the separate act stream.
    pieces = [features.reshape(N, F).astype(jnp.bfloat16),
              act.reshape(N, A).astype(jnp.bfloat16)]
    if Kp > F + A:
        pieces.append(jnp.zeros((N, Kp - F - A), jnp.bfloat16))
    x = jnp.concatenate(pieces, axis=-1)

    w1 = w1.astype(jnp.bfloat16)
    w2 = w2.astype(jnp.bfloat16)
    wo = wo.astype(jnp.bfloat16)

    # Token tile: large to amortize per-step overhead, multiple of 256, but
    # capped so the grid keeps >= 4 steps (v7x has 2 TCs sharing the grid).
    tm_eff = max(256, min(tm, _round_up(pl.cdiv(N, 4), 256)))
    grid = (pl.cdiv(N, tm_eff),)  # partial last block masked by Pallas

    def stream(width):            # streamed along the token axis
        return pl.BlockSpec((tm_eff, width), lambda i: (i, 0))

    def resident(shape):          # whole array resident in VMEM
        return pl.BlockSpec(shape, lambda i: (0, 0))

    flops = 2 * N * (Kp * H1p + H1p * H2p + H2p * Fop)
    bytes_accessed = (N * (Kp * 2 + Fop * 4)                        # streamed
                      + (Kp * H1p + H1p * H2p + H2p * Fop) * 2      # weights
                      + (H1p + H2p + Fop) * 4)                      # biases

    out = pl.pallas_call(
        forward_model_kernel,
        out_shape=jax.ShapeDtypeStruct((N, Fop), jnp.float32),
        grid_spec=pltpu.PrefetchScalarGridSpec(
            num_scalar_prefetch=0,
            grid=grid,
            in_specs=[
                stream(Kp),               # [feat|act]  (bf16)
                resident((Kp, H1p)),      # W1          (bf16)
                resident((1, H1p)),       # b1          (f32)
                resident((H1p, H2p)),     # W2          (bf16)
                resident((1, H2p)),       # b2          (f32)
                resident((H2p, Fop)),     # Wo          (bf16)
                resident((1, Fop)),       # bo          (f32)
            ],
            out_specs=stream(Fop),        # lane-dense (128-wide) output
        ),
        compiler_params=pltpu.CompilerParams(
            dimension_semantics=("parallel",),     # megacore splits token loop
            vmem_limit_bytes=32 * 1024 * 1024,     # covers v5e's 16 MiB default
        ),
        cost_estimate=pl.CostEstimate(
            flops=int(flops), transcendentals=0,
            bytes_accessed=int(bytes_accessed)),
    )(x, w1, b1, w2, b2, wo, bo)

    return out[:, :F].reshape(B, T, F)


# ----------------------------------------------------------------------------
# Deterministic parameter init mirroring nn.Linear + orthogonal_(gain=sqrt(2)),
# bias = 0.  Stored as (in, out) so the kernel computes x @ W.  Padding:
#   * K (feature_dim + act_dim) -> next multiple of 16 (bf16 sublane packing)
#   * hidden dims               -> next multiple of 128 (lane-dense)
#   * output dim                -> next multiple of 128 (lane-dense stores)
# All padding is zeros -> semantically inert.
# ----------------------------------------------------------------------------
def make_params(key, feature_dim, act_dim, hidden_sizes, lane=128):
    assert len(hidden_sizes) == 2, "kernel is specialized to two hidden layers"
    gain = float(np.sqrt(2.0))
    ortho = jax.nn.initializers.orthogonal(scale=gain)
    k1, k2, k3 = jax.random.split(key, 3)

    h1, h2 = hidden_sizes
    kp = _round_up(feature_dim + act_dim, 16)
    h1p = _round_up(h1, lane)
    h2p = _round_up(h2, lane)
    fop = _round_up(feature_dim, lane)

    def pad_to(w, rows, cols):
        return jnp.pad(w, ((0, rows - w.shape[0]), (0, cols - w.shape[1])))

    w1 = pad_to(ortho(k1, (feature_dim + act_dim, h1), jnp.float32), kp, h1p)
    b1 = jnp.zeros((1, h1p), jnp.float32)
    w2 = pad_to(ortho(k2, (h1, h2), jnp.float32), h1p, h2p)
    b2 = jnp.zeros((1, h2p), jnp.float32)
    wo = pad_to(ortho(k3, (h2, feature_dim), jnp.float32), h2p, fop)
    bo = jnp.zeros((1, fop), jnp.float32)
    return (w1, b1, w2, b2, wo, bo)


# ----------------------------------------------------------------------------
# Pure-JAX references.
#   match_bf16=True mimics the kernel's bf16 casts (inputs/weights/inter-layer
#   activations) with f32 math -> tight comparison.
#   match_bf16=False is the exact f32 module forward -> loose comparison.
# ----------------------------------------------------------------------------
def forward_model_ref(features, act, params, *, match_bf16=False):
    B, T, F = features.shape
    N = B * T
    w1, b1, w2, b2, wo, bo = params
    Kp = w1.shape[0]

    def cast(v):
        return v.astype(jnp.bfloat16).astype(jnp.float32) if match_bf16 else v

    x = jnp.concatenate([features.reshape(N, F), act.reshape(N, -1)],
                        axis=-1).astype(jnp.float32)
    x = jnp.pad(x, ((0, 0), (0, Kp - x.shape[1])))
    h = jax.nn.relu(cast(x) @ cast(w1) + b1)
    h = jax.nn.relu(cast(h) @ cast(w2) + b2)
    out = cast(h) @ cast(wo) + bo
    return out[:, :F].reshape(B, T, F)


if __name__ == "__main__":
    # Small shapes consistent with the module's forward:
    #   features: (B, T, feature_dim), act: (B, T, act_dim)
    # NOTE: at N = B*T = 16 the kernel is pure overhead vs XLA; the big-TM /
    # fused-K / lane-dense levers pay off at production-size B*T (thousands).
    B, T = 2, 8
    feature_dim, act_dim = 32, 4
    hidden_sizes = [64, 64]

    key = jax.random.PRNGKey(0)
    k_feat, k_act, k_param = jax.random.split(key, 3)

    features = jax.random.normal(k_feat, (B, T, feature_dim), dtype=jnp.float32)
    act = jax.random.normal(k_act, (B, T, act_dim), dtype=jnp.float32)

    params = make_params(k_param, feature_dim, act_dim, hidden_sizes)

    run = jax.jit(functools.partial(forward_model_pallas, tm=2048))
    out = run(features, act, params)
    out = jax.block_until_ready(out)
    assert out.shape == (B, T, feature_dim)

    # Tight check against a reference that matches the kernel's bf16 casts.
    ref_bf16 = forward_model_ref(features, act, params, match_bf16=True)
    np.testing.assert_allclose(np.asarray(out), np.asarray(ref_bf16),
                               rtol=2e-2, atol=2e-2)

    # Loose sanity check against the exact f32 module forward.
    ref_f32 = forward_model_ref(features, act, params, match_bf16=False)
    np.testing.assert_allclose(np.asarray(out), np.asarray(ref_f32),
                               rtol=1e-1, atol=1e-1)

    print("KERNEL_OK")
</pallas_src>

<mosaic_0001>
module attributes {stable_mosaic.version = 11 : i64} {
  func.func @forward_model_kernel(%arg0: i32, %arg1: memref<256x48xbf16, #tpu.memory_space<vmem>>, %arg2: memref<48x128xbf16, #tpu.memory_space<vmem>>, %arg3: memref<1x128xf32, #tpu.memory_space<vmem>>, %arg4: memref<128x128xbf16, #tpu.memory_space<vmem>>, %arg5: memref<1x128xf32, #tpu.memory_space<vmem>>, %arg6: memref<128x128xbf16, #tpu.memory_space<vmem>>, %arg7: memref<1x128xf32, #tpu.memory_space<vmem>>, %arg8: memref<256x128xf32, #tpu.memory_space<vmem>>) attributes {dimension_semantics = [#tpu.dimension_semantics<parallel>], iteration_bounds = array<i64: 1>, scalar_prefetch = 0 : i64, scratch_operands = 0 : i64, tpu.core_type = #tpu.core_type<tc>, window_params = [{transform_indices = @transform_0, window_bounds = array<i64: 256, 48>}, {pipeline_mode = #tpu.pipeline_mode<synchronous>, transform_indices = @transform_1, window_bounds = array<i64: 48, 128>}, {pipeline_mode = #tpu.pipeline_mode<synchronous>, transform_indices = @transform_2, window_bounds = array<i64: 1, 128>}, {pipeline_mode = #tpu.pipeline_mode<synchronous>, transform_indices = @transform_3, window_bounds = array<i64: 128, 128>}, {pipeline_mode = #tpu.pipeline_mode<synchronous>, transform_indices = @transform_4, window_bounds = array<i64: 1, 128>}, {pipeline_mode = #tpu.pipeline_mode<synchronous>, transform_indices = @transform_5, window_bounds = array<i64: 128, 128>}, {pipeline_mode = #tpu.pipeline_mode<synchronous>, transform_indices = @transform_6, window_bounds = array<i64: 1, 128>}, {transform_indices = @transform_7, window_bounds = array<i64: 256, 128>}]} {
    %c0 = arith.constant 0 : index
    %c0_0 = arith.constant 0 : index
    %0 = vector.load %arg1[%c0, %c0_0] : memref<256x48xbf16, #tpu.memory_space<vmem>>, vector<256x48xbf16>
    %c0_1 = arith.constant 0 : index
    %c0_2 = arith.constant 0 : index
    %1 = vector.load %arg2[%c0_1, %c0_2] : memref<48x128xbf16, #tpu.memory_space<vmem>>, vector<48x128xbf16>
    %cst = arith.constant dense<0.000000e+00> : vector<256x128xf32>
    %2 = tpu.matmul %0, %1, %cst {dimension_numbers = #tpu.dot_dimension_numbers<[1], [0], [0], [1], [0, 0, 1, 1], [], []>} : vector<256x48xbf16>, vector<48x128xbf16>, vector<256x128xf32> -> vector<256x128xf32>
    %c0_3 = arith.constant 0 : index
    %c0_4 = arith.constant 0 : index
    %3 = vector.load %arg3[%c0_3, %c0_4] : memref<1x128xf32, #tpu.memory_space<vmem>>, vector<1x128xf32>
    %4 = vector.broadcast %3 : vector<1x128xf32> to vector<256x128xf32>
    %5 = arith.addf %2, %4 : vector<256x128xf32>
    %cst_5 = arith.constant 0.000000e+00 : f32
    %6 = vector.broadcast %cst_5 : f32 to vector<256x128xf32>
    %7 = arith.maximumf %5, %6 : vector<256x128xf32>
    %8 = arith.truncf %7 : vector<256x128xf32> to vector<256x128xbf16>
    %c0_6 = arith.constant 0 : index
    %c0_7 = arith.constant 0 : index
    %9 = vector.load %arg4[%c0_6, %c0_7] : memref<128x128xbf16, #tpu.memory_space<vmem>>, vector<128x128xbf16>
    %cst_8 = arith.constant dense<0.000000e+00> : vector<256x128xf32>
    %10 = tpu.matmul %8, %9, %cst_8 {dimension_numbers = #tpu.dot_dimension_numbers<[1], [0], [0], [1], [0, 0, 1, 1], [], []>} : vector<256x128xbf16>, vector<128x128xbf16>, vector<256x128xf32> -> vector<256x128xf32>
    %c0_9 = arith.constant 0 : index
    %c0_10 = arith.constant 0 : index
    %11 = vector.load %arg5[%c0_9, %c0_10] : memref<1x128xf32, #tpu.memory_space<vmem>>, vector<1x128xf32>
    %12 = vector.broadcast %11 : vector<1x128xf32> to vector<256x128xf32>
    %13 = arith.addf %10, %12 : vector<256x128xf32>
    %cst_11 = arith.constant 0.000000e+00 : f32
    %14 = vector.broadcast %cst_11 : f32 to vector<256x128xf32>
    %15 = arith.maximumf %13, %14 : vector<256x128xf32>
    %16 = arith.truncf %15 : vector<256x128xf32> to vector<256x128xbf16>
    %c0_12 = arith.constant 0 : index
    %c0_13 = arith.constant 0 : index
    %17 = vector.load %arg6[%c0_12, %c0_13] : memref<128x128xbf16, #tpu.memory_space<vmem>>, vector<128x128xbf16>
    %cst_14 = arith.constant dense<0.000000e+00> : vector<256x128xf32>
    %18 = tpu.matmul %16, %17, %cst_14 {dimension_numbers = #tpu.dot_dimension_numbers<[1], [0], [0], [1], [0, 0, 1, 1], [], []>} : vector<256x128xbf16>, vector<128x128xbf16>, vector<256x128xf32> -> vector<256x128xf32>
    %c0_15 = arith.constant 0 : index
    %c0_16 = arith.constant 0 : index
    %19 = vector.load %arg7[%c0_15, %c0_16] : memref<1x128xf32, #tpu.memory_space<vmem>>, vector<1x128xf32>
    %20 = vector.broadcast %19 : vector<1x128xf32> to vector<256x128xf32>
    %21 = arith.addf %18, %20 : vector<256x128xf32>
    %c0_17 = arith.constant 0 : index
    %c0_18 = arith.constant 0 : index
    %22 = vector.load %arg8[%c0_17, %c0_18] : memref<256x128xf32, #tpu.memory_space<vmem>>, vector<256x128xf32>
    tpu.vector_store %arg8[%c0_17, %c0_18], %21 {strides = array<i32>} : memref<256x128xf32, #tpu.memory_space<vmem>>, vector<256x128xf32>,
    return
  }
  func.func @transform_0(%arg0: i32) -> (i32, i32) {
    %c0_i32 = arith.constant 0 : i32
    %c0_i32_0 = arith.constant 0 : i32
    return %arg0, %c0_i32 : i32, i32
  }
  func.func @transform_1(%arg0: i32) -> (i32, i32) {
    %c0_i32 = arith.constant 0 : i32
    %c0_i32_0 = arith.constant 0 : i32
    %c0_i32_1 = arith.constant 0 : i32
    return %c0_i32, %c0_i32_0 : i32, i32
  }
  func.func @transform_2(%arg0: i32) -> (i32, i32) {
    %c0_i32 = arith.constant 0 : i32
    %c0_i32_0 = arith.constant 0 : i32
    %c0_i32_1 = arith.constant 0 : i32
    return %c0_i32, %c0_i32_0 : i32, i32
  }
  func.func @transform_3(%arg0: i32) -> (i32, i32) {
    %c0_i32 = arith.constant 0 : i32
    %c0_i32_0 = arith.constant 0 : i32
    %c0_i32_1 = arith.constant 0 : i32
    return %c0_i32, %c0_i32_0 : i32, i32
  }
  func.func @transform_4(%arg0: i32) -> (i32, i32) {
    %c0_i32 = arith.constant 0 : i32
    %c0_i32_0 = arith.constant 0 : i32
    %c0_i32_1 = arith.constant 0 : i32
    return %c0_i32, %c0_i32_0 : i32, i32
  }
  func.func @transform_5(%arg0: i32) -> (i32, i32) {
    %c0_i32 = arith.constant 0 : i32
    %c0_i32_0 = arith.constant 0 : i32
    %c0_i32_1 = arith.constant 0 : i32
    return %c0_i32, %c0_i32_0 : i32, i32
  }
  func.func @transform_6(%arg0: i32) -> (i32, i32) {
    %c0_i32 = arith.constant 0 : i32
    %c0_i32_0 = arith.constant 0 : i32
    %c0_i32_1 = arith.constant 0 : i32
    return %c0_i32, %c0_i32_0 : i32, i32
  }
  func.func @transform_7(%arg0: i32) -> (i32, i32) {
    %c0_i32 = arith.constant 0 : i32
    %c0_i32_0 = arith.constant 0 : i32
    return %arg0, %c0_i32 : i32, i32
  }
}

</mosaic_0001>

<bundles_post_ra>
// kernel: forward_model_pallas.1
= control target key start
LH: loop header
LB: loop body
LE: loop exit
PB: predicated region body
PF: predicated region fallthrough
CT: control target
= control target key end

     0   :  { %vm170_vm0 = vcmask 392192   ;;  %s1568_s0 = inlined_call_operand.vmem [shape: bf16[16,48], index: 0, kind: input, shape index: {}]   ;;  %s1569_s1 = inlined_call_operand.vmem [shape: bf16[48,128], index: 1, kind: input, shape index: {}]   ;;  %s1570_s2 = inlined_call_operand.vmem [shape: f32[1,128], index: 2, kind: input, shape index: {}]   ;;  %s1571_s3 = inlined_call_operand.vmem [shape: bf16[128,128], index: 3, kind: input, shape index: {}]   ;;  %s1572_s4 = inlined_call_operand.vmem [shape: f32[1,128], index: 4, kind: input, shape index: {}]   ;;  %s1573_s5 = inlined_call_operand.vmem [shape: bf16[128,128], index: 5, kind: input, shape index: {}]   ;;  %s1574_s6 = inlined_call_operand.vmem [shape: f32[1,128], index: 6, kind: input, shape index: {}]   ;;  %s1575_s7 = inlined_call_operand.vmem [shape: f32[16,128], index: 7, kind: output, shape index: {}]  }
   0x1   :  { %v1277_v0 = vld [vmem:[%s1569_s1] sm:$0xff]   ;;  %v1278_v1 = vld [vmem:[%s1569_s1 + $0x8] sm:$0xff]   ;;  %v1279_v3 = vld [vmem:[%s1569_s1 + $0x10] sm:$0xff]  }
   0x2   :  { %1137 = vmatprep.subr.bf16.mxu0 %v1277_v0  ;;  %1271 = vmatprep.subr.bf16.mxu1 %v1277_v0  ;;  %v1280_v2 = vld [vmem:[%s1568_s0] sm:$0xff]   ;;  %v1281_v4 = vld [vmem:[%s1568_s0 + $0x8] sm:$0xff]   ;;  %v1282_v5 = vld [vmem:[%s1568_s0 + $0x10] sm:$0xff]  }
   0x3   :  { %1138 = vmatpush3.bf16.msra.mxu0 %v1277_v0  ;;  %1274 = vmatpush3.bf16.msra.mxu1 %v1277_v0  ;;  %v1288_v6 = vld [vmem:[%s1568_s0 + $0x40] sm:$0xff]   ;;  %v1289_v7 = vld [vmem:[%s1568_s0 + $0x48] sm:$0xff]   ;;  %v1290_v8 = vld [vmem:[%s1568_s0 + $0x50] sm:$0xff]  }
   0x4   :  { %1139 = vmatprep.subr.bf16.mxu0 %v1278_v1  ;;  %1272 = vmatprep.subr.bf16.mxu1 %v1278_v1  ;;  %v1283_v9 = vld [vmem:[%s1568_s0 + $0x18] sm:$0xff]   ;;  %v1284_v10 = vld [vmem:[%s1568_s0 + $0x20] sm:$0xff]   ;;  %v1297_v14 = vld [vmem:[%s1571_s3 + $0x8] sm:$0xff]  }
   0x5   :  { %1143 = vmatprep.mubr.msk.bf16.mxu0 %vm170_vm0, %v1280_v2  ;;  %1159 = vmatprep.mubr.msk.bf16.mxu1 %vm170_vm0, %v1288_v6  ;;  %v1291_v11 = vld [vmem:[%s1568_s0 + $0x58] sm:$0xff]   ;;  %v1292_v12 = vld [vmem:[%s1568_s0 + $0x60] sm:$0xff]   ;;  %v1285_v15 = vld [vmem:[%s1568_s0 + $0x28] sm:$0xff]  }
   0x6   :  { %v1296_v13 = vld [vmem:[%s1571_s3] sm:$0xff]   ;;  %v1293_v16 = vld [vmem:[%s1568_s0 + $0x68] sm:$0xff]   ;;  %v1298_v17 = vld [vmem:[%s1571_s3 + $0x10] sm:$0xff]  }
   0x7   :  { %1140 = vmatpush3.bf16.msra.mxu0 %v1278_v1  ;;  %1275 = vmatpush3.bf16.msra.mxu1 %v1278_v1  ;;  %v1286_v18 = vld [vmem:[%s1568_s0 + $0x30] sm:$0xff]   ;;  %v1299_v20 = vld [vmem:[%s1571_s3 + $0x18] sm:$0xff]   ;;  %v1300_v21 = vld [vmem:[%s1571_s3 + $0x20] sm:$0xff]  }
   0x8   :  { %1141 = vmatprep.subr.bf16.mxu0 %v1279_v3  ;;  %1273 = vmatprep.subr.bf16.mxu1 %v1279_v3  ;;  %v1294_v19 = vld [vmem:[%s1568_s0 + $0x70] sm:$0xff]   ;;  %v1287_v22 = vld [vmem:[%s1568_s0 + $0x38] sm:$0xff]   ;;  %v1301_v24 = vld [vmem:[%s1571_s3 + $0x28] sm:$0xff]  }
   0x9   :  { %v1295_v23 = vld [vmem:[%s1568_s0 + $0x78] sm:$0xff]   ;;  %v1302_v25 = vld [vmem:[%s1571_s3 + $0x30] sm:$0xff]   ;;  %v1304_v27 = vld [vmem:[%s1573_s5] sm:$0xff]  }
   0xa   :  { %v1303_v26 = vld [vmem:[%s1571_s3 + $0x38] sm:$0xff]   ;;  %v1305_v28 = vld [vmem:[%s1573_s5 + $0x8] sm:$0xff]   ;;  %v1306_v29 = vld [vmem:[%s1573_s5 + $0x10] sm:$0xff]  }
   0xb   :  { %1142 = vmatpush3.bf16.msra.mxu0 %v1279_v3  ;;  %1276 = vmatpush3.bf16.msra.mxu1 %v1279_v3  ;;  %v1307_v30 = vld [vmem:[%s1573_s5 + $0x18] sm:$0xff]   ;;  %v1308_v31 = vld [vmem:[%s1573_s5 + $0x20] sm:$0xff]   ;;  %v1309_v32 = vld [vmem:[%s1573_s5 + $0x28] sm:$0xff]  }
   0xc   :  { %1175 = vmatprep.subr.bf16.mxu1 %v1296_v13  ;;  %1223 = vmatprep.subr.bf16.mxu0 %v1304_v27  ;;  %v1470_v33 = vld [vmem:[%s1570_s2] ss:$0 sm:$0xff] }
   0xe   :  { %1144 = vmatmul.mubr.msk.bf16.vlgmr.msra.gmra.mrb[0].mxu0 %vm170_vm0, %v1281_v4  ;;  %1160 = vmatmul.mubr.msk.bf16.vlgmr.msra.gmra.mrb[0].mxu1 %vm170_vm0, %v1289_v7 }
   0xf   :  { %1147 = vmatprep.mubr.msk.bf16.mxu0 %vm170_vm0, %v1282_v5  ;;  %1163 = vmatprep.mubr.msk.bf16.mxu1 %vm170_vm0, %v1290_v8 }
  0x10   :  { %1176 = vmatpush3.bf16.msra.mxu1 %v1296_v13  ;;  %1224 = vmatpush3.bf16.msra.mxu0 %v1304_v27 }
  0x11   :  { %1177 = vmatprep.subr.bf16.mxu1 %v1297_v14  ;;  %1225 = vmatprep.subr.bf16.mxu0 %v1305_v28 }
  0x14   :  { %1178 = vmatpush3.bf16.msra.mxu1 %v1297_v14  ;;  %1226 = vmatpush3.bf16.msra.mxu0 %v1305_v28 }
  0x15   :  { %1179 = vmatprep.subr.bf16.mxu1 %v1298_v17  ;;  %1227 = vmatprep.subr.bf16.mxu0 %v1306_v29 }
  0x16   :  { %1148 = vmatmul.mubr.msk.bf16.gmra.mrb[4].mxu0 %vm170_vm0, %v1283_v9  ;;  %1164 = vmatmul.mubr.msk.bf16.gmra.mrb[4].mxu1 %vm170_vm0, %v1291_v11 }
  0x17   :  { %1151 = vmatprep.mubr.msk.bf16.mxu0 %vm170_vm0, %v1284_v10  ;;  %1167 = vmatprep.mubr.msk.bf16.mxu1 %vm170_vm0, %v1292_v12 }
  0x18   :  { %1180 = vmatpush3.bf16.msra.mxu1 %v1298_v17  ;;  %1228 = vmatpush3.bf16.msra.mxu0 %v1306_v29 }
  0x19   :  { %1181 = vmatprep.subr.bf16.mxu1 %v1299_v20  ;;  %1229 = vmatprep.subr.bf16.mxu0 %v1307_v30 }
  0x1c   :  { %1182 = vmatpush3.bf16.msra.mxu1 %v1299_v20  ;;  %1230 = vmatpush3.bf16.msra.mxu0 %v1307_v30 }
  0x1d   :  { %1183 = vmatprep.subr.bf16.mxu1 %v1300_v21  ;;  %1231 = vmatprep.subr.bf16.mxu0 %v1308_v31 }
  0x1e   :  { %1152 = vmatmul.mubr.msk.bf16.gmra.mrb[8].mxu0 %vm170_vm0, %v1285_v15  ;;  %1168 = vmatmul.mubr.msk.bf16.gmra.mrb[8].mxu1 %vm170_vm0, %v1293_v16 }
  0x1f   :  { %1155 = vmatprep.mubr.msk.bf16.mxu0 %vm170_vm0, %v1286_v18  ;;  %1171 = vmatprep.mubr.msk.bf16.mxu1 %vm170_vm0, %v1294_v19 }
  0x20   :  { %1184 = vmatpush3.bf16.msra.mxu1 %v1300_v21  ;;  %1232 = vmatpush3.bf16.msra.mxu0 %v1308_v31 }
  0x21   :  { %1185 = vmatprep.subr.bf16.mxu1 %v1301_v24  ;;  %1233 = vmatprep.subr.bf16.mxu0 %v1309_v32 }
  0x24   :  { %1186 = vmatpush3.bf16.msra.mxu1 %v1301_v24  ;;  %1234 = vmatpush3.bf16.msra.mxu0 %v1309_v32 }
  0x25   :  { %1187 = vmatprep.subr.bf16.mxu1 %v1302_v25 }
  0x26   :  { %1156 = vmatmul.mubr.msk.bf16.gmra.mrb[12].mxu0 %vm170_vm0, %v1287_v22  ;;  %1172 = vmatmul.mubr.msk.bf16.gmra.mrb[12].mxu1 %vm170_vm0, %v1295_v23 }
  0x28   :  { %1188 = vmatpush3.bf16.msra.mxu1 %v1302_v25 }
  0x29   :  { %1189 = vmatprep.subr.bf16.mxu1 %v1303_v26 }
  0x2c   :  { %1190 = vmatpush3.bf16.msra.mxu1 %v1303_v26 }
  0xe1   :  { %v1145_v34 = vpop.f32.mrb[0].mxu0  ;;  %v1161_v35 = vpop.f32.mrb[0].mxu1 }
  0xe2   :  { %v262_v36 = vadd.f32 %v1145_v34, %v1470_v33  ;;  %v253_v37 = vpop.f32.mrb[1].mxu0  ;;  %v326_v38 = vadd.f32 %v1161_v35, %v1470_v33  ;;  %v317_v39 = vpop.f32.mrb[1].mxu1 }
  0xe3   :  { %v254_v40 = vadd.f32 %v1470_v33, %v253_v37  ;;  %v1146_v41 = vpop.f32.mrb[2].mxu0  ;;  %v318_v42 = vadd.f32 %v1470_v33, %v317_v39  ;;  %v1162_v43 = vpop.f32.mrb[2].mxu1 }
  0xe4   :  { %v265_v44 = vadd.f32 %v1146_v41, %v1470_v33  ;;  %v256_v45 = vpop.f32.mrb[3].mxu0  ;;  %v398_v46 = vmax.f32 %v326_v38, 0.0  ;;  %v329_v47 = vadd.f32 %v1162_v43, %v1470_v33  ;;  %v320_v48 = vpop.f32.mrb[3].mxu1  ;;  %v382_v52 = vmax.f32 %v262_v36, 0.0 }
  0xe5   :  { %v257_v49 = vadd.f32 %v1470_v33, %v256_v45  ;;  %v396_v50 = vmax.f32 %v318_v42, 0.0  ;;  %v321_v51 = vadd.f32 %v1470_v33, %v320_v48  ;;  %v380_v55 = vmax.f32 %v254_v40, 0.0 }
  0xe6   :  { %v383_v53 = vmax.f32 %v265_v44, 0.0  ;;  %v399_v54 = vmax.f32 %v329_v47, 0.0 }
  0xe7   :  { %v381_v56 = vmax.f32 %v257_v49, 0.0  ;;  %v397_v57 = vmax.f32 %v321_v51, 0.0 }
  0xe8   :  { %v413_v58 = vpack.c.bf16 %v383_v53, %v382_v52  ;;  %v1480_v59 = vpack.c.bf16 %v399_v54, %v398_v46 }
  0xe9   :  { %v412_v60 = vpack.c.bf16 %v381_v56, %v380_v55  ;;  %v1149_v61 = vpop.f32.mrb[4].mxu0  ;;  %v1482_v62 = vpack.c.bf16 %v397_v57, %v396_v50  ;;  %v1165_v63 = vpop.f32.mrb[4].mxu1 }
  0xea   :  { %v278_v0 = vadd.f32 %v1149_v61, %v1470_v33  ;;  %v269_v1 = vpop.f32.mrb[5].mxu0  ;;  %v342_v2 = vadd.f32 %v1165_v63, %v1470_v33  ;;  %v333_v3 = vpop.f32.mrb[5].mxu1 }
  0xeb   :  { %v270_v4 = vadd.f32 %v1470_v33, %v269_v1  ;;  %v1150_v5 = vpop.f32.mrb[6].mxu0  ;;  %1191 = vmatprep.mubr.bf16.mxu1 %v412_v60  ;;  %v334_v6 = vadd.f32 %v1470_v33, %v333_v3  ;;  %v1166_v7 = vpop.f32.mrb[6].mxu1 }
  0xec   :  { %v281_v8 = vadd.f32 %v1150_v5, %v1470_v33  ;;  %v272_v9 = vpop.f32.mrb[7].mxu0  ;;  %1192 = vmatmul.mubr.bf16.vlgmr.msra.gmra.mrb[16].mxu1 %v413_v58  ;;  %v402_v10 = vmax.f32 %v342_v2, 0.0  ;;  %v345_v11 = vadd.f32 %v1166_v7, %v1470_v33  ;;  %v336_v12 = vpop.f32.mrb[7].mxu1  ;;  %v386_v16 = vmax.f32 %v278_v0, 0.0 }
  0xed   :  { %v273_v13 = vadd.f32 %v1470_v33, %v272_v9  ;;  %v400_v14 = vmax.f32 %v334_v6, 0.0  ;;  %v337_v15 = vadd.f32 %v1470_v33, %v336_v12  ;;  %v384_v19 = vmax.f32 %v270_v4, 0.0 }
  0xee   :  { %v387_v17 = vmax.f32 %v281_v8, 0.0  ;;  %v403_v18 = vmax.f32 %v345_v11, 0.0 }
  0xef   :  { %v385_v20 = vmax.f32 %v273_v13, 0.0  ;;  %v401_v21 = vmax.f32 %v337_v15, 0.0 }
  0xf0   :  { %v415_v22 = vpack.c.bf16 %v387_v17, %v386_v16  ;;  %v1492_v23 = vpack.c.bf16 %v403_v18, %v402_v10 }
  0xf1   :  { %v414_v24 = vpack.c.bf16 %v385_v20, %v384_v19  ;;  %v1153_v25 = vpop.f32.mrb[8].mxu0  ;;  %v1494_v26 = vpack.c.bf16 %v401_v21, %v400_v14  ;;  %v1169_v27 = vpop.f32.mrb[8].mxu1 }
  0xf2   :  { %v294_v28 = vadd.f32 %v1153_v25, %v1470_v33  ;;  %v285_v29 = vpop.f32.mrb[9].mxu0  ;;  %v358_v30 = vadd.f32 %v1169_v27, %v1470_v33  ;;  %v349_v31 = vpop.f32.mrb[9].mxu1 }
  0xf3   :  { %v286_v32 = vadd.f32 %v1470_v33, %v285_v29  ;;  %v1154_v34 = vpop.f32.mrb[10].mxu0  ;;  %1195 = vmatprep.mubr.bf16.mxu1 %v414_v24  ;;  %v350_v35 = vadd.f32 %v1470_v33, %v349_v31  ;;  %v1170_v36 = vpop.f32.mrb[10].mxu1 }
  0xf4   :  { %v297_v37 = vadd.f32 %v1154_v34, %v1470_v33  ;;  %v288_v38 = vpop.f32.mrb[11].mxu0  ;;  %1196 = vmatmul.mubr.bf16.gmra.mrb[20].mxu1 %v415_v22  ;;  %v406_v39 = vmax.f32 %v358_v30, 0.0  ;;  %v361_v40 = vadd.f32 %v1170_v36, %v1470_v33  ;;  %v352_v41 = vpop.f32.mrb[11].mxu1  ;;  %v390_v45 = vmax.f32 %v294_v28, 0.0 }
  0xf5   :  { %v289_v42 = vadd.f32 %v1470_v33, %v288_v38  ;;  %v404_v43 = vmax.f32 %v350_v35, 0.0  ;;  %v353_v44 = vadd.f32 %v1470_v33, %v352_v41  ;;  %v388_v48 = vmax.f32 %v286_v32, 0.0 }
  0xf6   :  { %v391_v46 = vmax.f32 %v297_v37, 0.0  ;;  %v407_v47 = vmax.f32 %v361_v40, 0.0 }
  0xf7   :  { %v389_v49 = vmax.f32 %v289_v42, 0.0  ;;  %v405_v50 = vmax.f32 %v353_v44, 0.0 }
  0xf8   :  { %v417_v51 = vpack.c.bf16 %v391_v46, %v390_v45  ;;  %v425_v52 = vpack.c.bf16 %v407_v47, %v406_v39 }
  0xf9   :  { %v416_v53 = vpack.c.bf16 %v389_v49, %v388_v48  ;;  %v1157_v54 = vpop.f32.mrb[12].mxu0  ;;  %v424_v55 = vpack.c.bf16 %v405_v50, %v404_v43  ;;  %v1173_v56 = vpop.f32.mrb[12].mxu1 }
  0xfa   :  { %v310_v57 = vadd.f32 %v1157_v54, %v1470_v33  ;;  %v301_v58 = vpop.f32.mrb[13].mxu0  ;;  %v374_v60 = vadd.f32 %v1173_v56, %v1470_v33  ;;  %v365_v61 = vpop.f32.mrb[13].mxu1 }
  0xfb   :  { %v302_v63 = vadd.f32 %v1470_v33, %v301_v58  ;;  %v1158_v0 = vpop.f32.mrb[14].mxu0  ;;  %1199 = vmatprep.mubr.bf16.mxu1 %v416_v53  ;;  %v366_v1 = vadd.f32 %v1470_v33, %v365_v61  ;;  %v1174_v2 = vpop.f32.mrb[14].mxu1 }
  0xfc   :  { %v313_v3 = vadd.f32 %v1158_v0, %v1470_v33  ;;  %v304_v4 = vpop.f32.mrb[15].mxu0  ;;  %1200 = vmatmul.mubr.bf16.gmra.mrb[24].mxu1 %v417_v51  ;;  %v410_v5 = vmax.f32 %v374_v60, 0.0  ;;  %v377_v6 = vadd.f32 %v1174_v2, %v1470_v33  ;;  %v368_v7 = vpop.f32.mrb[15].mxu1  ;;  %v394_v11 = vmax.f32 %v310_v57, 0.0 }
  0xfd   :  { %v305_v8 = vadd.f32 %v1470_v33, %v304_v4  ;;  %v408_v9 = vmax.f32 %v366_v1, 0.0  ;;  %v369_v10 = vadd.f32 %v1470_v33, %v368_v7  ;;  %v392_v14 = vmax.f32 %v302_v63, 0.0  ;;  %v1310_v33 = vld [vmem:[%s1573_s5 + $0x30] sm:$0xff]  }
  0xfe   :  { %v395_v12 = vmax.f32 %v313_v3, 0.0  ;;  %v411_v13 = vmax.f32 %v377_v6, 0.0  ;;  %1235 = vmatprep.subr.bf16.mxu0 %v1310_v33 }
  0xff   :  { %v393_v15 = vmax.f32 %v305_v8, 0.0  ;;  %v409_v16 = vmax.f32 %v369_v10, 0.0  ;;  %1236 = vmatpush3.bf16.msra.mxu0 %v1310_v33 }
 0x100   :  { %v419_v17 = vpack.c.bf16 %v395_v12, %v394_v11  ;;  %v427_v18 = vpack.c.bf16 %v411_v13, %v410_v5 }
 0x101   :  { %v418_v19 = vpack.c.bf16 %v393_v15, %v392_v14  ;;  %v426_v20 = vpack.c.bf16 %v409_v16, %v408_v9 }
 0x103   :  { %1203 = vmatprep.mubr.bf16.mxu1 %v418_v19 }
 0x104   :  { %1204 = vmatmul.mubr.bf16.gmra.mrb[28].mxu1 %v419_v17 }
 0x105   :  { %1207 = vmatprep.mubr.bf16.mxu1 %v1482_v62  ;;  %v1311_v62 = vld [vmem:[%s1573_s5 + $0x38] sm:$0xff]  }
 0x106   :  { %1237 = vmatprep.subr.bf16.mxu0 %v1311_v62 }
 0x107   :  { %1238 = vmatpush3.bf16.msra.mxu0 %v1311_v62 }
 0x10c   :  { %1208 = vmatmul.mubr.bf16.gmra.mrb[32].mxu1 %v1480_v59  ;;  %v1525_v59 = vld [vmem:[%s1572_s4] ss:$0 sm:$0xff] }
 0x10d   :  { %1211 = vmatprep.mubr.bf16.mxu1 %v1494_v26 }
 0x114   :  { %1212 = vmatmul.mubr.bf16.gmra.mrb[36].mxu1 %v1492_v23 }
 0x115   :  { %1215 = vmatprep.mubr.bf16.mxu1 %v424_v55 }
 0x11c   :  { %1216 = vmatmul.mubr.bf16.gmra.mrb[40].mxu1 %v425_v52 }
 0x11d   :  { %1219 = vmatprep.mubr.bf16.mxu1 %v426_v20 }
 0x124   :  { %1220 = vmatmul.mubr.bf16.gmra.mrb[44].mxu1 %v427_v18 }
 0x1bf   :  { %v1193_v21 = vpop.f32.mrb[16].mxu1 }
 0x1c0   :  { %v542_v22 = vadd.f32 %v1193_v21, %v1525_v59  ;;  %v533_v23 = vpop.f32.mrb[17].mxu1 }
 0x1c1   :  { %v534_v24 = vadd.f32 %v1525_v59, %v533_v23  ;;  %v1194_v25 = vpop.f32.mrb[18].mxu1 }
 0x1c2   :  { %v545_v26 = vadd.f32 %v1194_v25, %v1525_v59  ;;  %v536_v27 = vpop.f32.mrb[19].mxu1  ;;  %v662_v29 = vmax.f32 %v542_v22, 0.0 }
 0x1c3   :  { %v537_v28 = vadd.f32 %v1525_v59, %v536_v27  ;;  %v660_v31 = vmax.f32 %v534_v24, 0.0 }
 0x1c4   :  { %v663_v30 = vmax.f32 %v545_v26, 0.0 }
 0x1c5   :  { %v661_v32 = vmax.f32 %v537_v28, 0.0 }
 0x1c6   :  { %v693_v34 = vpack.c.bf16 %v663_v30, %v662_v29 }
 0x1c7   :  { %v692_v35 = vpack.c.bf16 %v661_v32, %v660_v31  ;;  %v1197_v36 = vpop.f32.mrb[20].mxu1 }
 0x1c8   :  { %v558_v37 = vadd.f32 %v1197_v36, %v1525_v59  ;;  %v549_v38 = vpop.f32.mrb[21].mxu1 }
 0x1c9   :  { %v550_v39 = vadd.f32 %v1525_v59, %v549_v38  ;;  %v1198_v40 = vpop.f32.mrb[22].mxu1  ;;  %1239 = vmatprep.mubr.bf16.mxu0 %v692_v35 }
 0x1ca   :  { %v561_v41 = vadd.f32 %v1198_v40, %v1525_v59  ;;  %v552_v42 = vpop.f32.mrb[23].mxu1  ;;  %1240 = vmatmul.mubr.bf16.vlgmr.msra.gmra.mrb[16].mxu0 %v693_v34  ;;  %v666_v44 = vmax.f32 %v558_v37, 0.0 }
 0x1cb   :  { %v553_v43 = vadd.f32 %v1525_v59, %v552_v42  ;;  %v664_v46 = vmax.f32 %v550_v39, 0.0 }
 0x1cc   :  { %v667_v45 = vmax.f32 %v561_v41, 0.0 }
 0x1cd   :  { %v665_v47 = vmax.f32 %v553_v43, 0.0 }
 0x1ce   :  { %v695_v48 = vpack.c.bf16 %v667_v45, %v666_v44 }
 0x1cf   :  { %v694_v49 = vpack.c.bf16 %v665_v47, %v664_v46  ;;  %v1201_v50 = vpop.f32.mrb[24].mxu1 }
 0x1d0   :  { %v574_v51 = vadd.f32 %v1201_v50, %v1525_v59  ;;  %v565_v52 = vpop.f32.mrb[25].mxu1 }
 0x1d1   :  { %v566_v53 = vadd.f32 %v1525_v59, %v565_v52  ;;  %v1202_v54 = vpop.f32.mrb[26].mxu1  ;;  %1243 = vmatprep.mubr.bf16.mxu0 %v694_v49 }
 0x1d2   :  { %v577_v55 = vadd.f32 %v1202_v54, %v1525_v59  ;;  %v568_v56 = vpop.f32.mrb[27].mxu1  ;;  %1244 = vmatmul.mubr.bf16.gmra.mrb[20].mxu0 %v695_v48  ;;  %v670_v58 = vmax.f32 %v574_v51, 0.0 }
 0x1d3   :  { %v569_v57 = vadd.f32 %v1525_v59, %v568_v56  ;;  %v668_v61 = vmax.f32 %v566_v53, 0.0 }
 0x1d4   :  { %v671_v60 = vmax.f32 %v577_v55, 0.0 }
 0x1d5   :  { %v669_v63 = vmax.f32 %v569_v57, 0.0 }
 0x1d6   :  { %v697_v0 = vpack.c.bf16 %v671_v60, %v670_v58 }
 0x1d7   :  { %v696_v1 = vpack.c.bf16 %v669_v63, %v668_v61  ;;  %v1205_v2 = vpop.f32.mrb[28].mxu1 }
 0x1d8   :  { %v590_v3 = vadd.f32 %v1205_v2, %v1525_v59  ;;  %v581_v4 = vpop.f32.mrb[29].mxu1 }
 0x1d9   :  { %v582_v5 = vadd.f32 %v1525_v59, %v581_v4  ;;  %v1206_v6 = vpop.f32.mrb[30].mxu1  ;;  %1247 = vmatprep.mubr.bf16.mxu0 %v696_v1 }
 0x1da   :  { %v593_v7 = vadd.f32 %v1206_v6, %v1525_v59  ;;  %v584_v8 = vpop.f32.mrb[31].mxu1  ;;  %1248 = vmatmul.mubr.bf16.gmra.mrb[24].mxu0 %v697_v0  ;;  %v674_v10 = vmax.f32 %v590_v3, 0.0 }
 0x1db   :  { %v585_v9 = vadd.f32 %v1525_v59, %v584_v8  ;;  %v672_v12 = vmax.f32 %v582_v5, 0.0 }
 0x1dc   :  { %v675_v11 = vmax.f32 %v593_v7, 0.0 }
 0x1dd   :  { %v673_v13 = vmax.f32 %v585_v9, 0.0  ;;  %v1061_v9 = vld [vmem:[%s1574_s6] ss:$0 sm:$0xff] }
 0x1de   :  { %v699_v14 = vpack.c.bf16 %v675_v11, %v674_v10 }
 0x1df   :  { %v698_v15 = vpack.c.bf16 %v673_v13, %v672_v12  ;;  %v1209_v16 = vpop.f32.mrb[32].mxu1 }
 0x1e0   :  { %v606_v17 = vadd.f32 %v1209_v16, %v1525_v59  ;;  %v597_v18 = vpop.f32.mrb[33].mxu1 }
 0x1e1   :  { %v598_v19 = vadd.f32 %v1525_v59, %v597_v18  ;;  %v1210_v20 = vpop.f32.mrb[34].mxu1  ;;  %1251 = vmatprep.mubr.bf16.mxu0 %v698_v15 }
 0x1e2   :  { %v609_v33 = vadd.f32 %v1210_v20, %v1525_v59  ;;  %v600_v62 = vpop.f32.mrb[35].mxu1  ;;  %1252 = vmatmul.mubr.bf16.gmra.mrb[28].mxu0 %v699_v14  ;;  %v678_v22 = vmax.f32 %v606_v17, 0.0 }
 0x1e3   :  { %v601_v21 = vadd.f32 %v1525_v59, %v600_v62  ;;  %v676_v24 = vmax.f32 %v598_v19, 0.0 }
 0x1e4   :  { %v679_v23 = vmax.f32 %v609_v33, 0.0 }
 0x1e5   :  { %v677_v25 = vmax.f32 %v601_v21, 0.0 }
 0x1e6   :  { %v701_v26 = vpack.c.bf16 %v679_v23, %v678_v22 }
 0x1e7   :  { %v700_v27 = vpack.c.bf16 %v677_v25, %v676_v24  ;;  %v1213_v28 = vpop.f32.mrb[36].mxu1 }
 0x1e8   :  { %v622_v29 = vadd.f32 %v1213_v28, %v1525_v59  ;;  %v613_v30 = vpop.f32.mrb[37].mxu1 }
 0x1e9   :  { %v614_v31 = vadd.f32 %v1525_v59, %v613_v30  ;;  %v1214_v32 = vpop.f32.mrb[38].mxu1  ;;  %1255 = vmatprep.mubr.bf16.mxu0 %v700_v27 }
 0x1ea   :  { %v625_v34 = vadd.f32 %v1214_v32, %v1525_v59  ;;  %v616_v35 = vpop.f32.mrb[39].mxu1  ;;  %1256 = vmatmul.mubr.bf16.gmra.mrb[32].mxu0 %v701_v26  ;;  %v682_v37 = vmax.f32 %v622_v29, 0.0 }
 0x1eb   :  { %v617_v36 = vadd.f32 %v1525_v59, %v616_v35  ;;  %v680_v39 = vmax.f32 %v614_v31, 0.0 }
 0x1ec   :  { %v683_v38 = vmax.f32 %v625_v34, 0.0 }
 0x1ed   :  { %v681_v40 = vmax.f32 %v617_v36, 0.0 }
 0x1ee   :  { %v703_v41 = vpack.c.bf16 %v683_v38, %v682_v37 }
 0x1ef   :  { %v702_v42 = vpack.c.bf16 %v681_v40, %v680_v39  ;;  %v1217_v43 = vpop.f32.mrb[40].mxu1 }
 0x1f0   :  { %v638_v44 = vadd.f32 %v1217_v43, %v1525_v59  ;;  %v629_v45 = vpop.f32.mrb[41].mxu1 }
 0x1f1   :  { %v630_v46 = vadd.f32 %v1525_v59, %v629_v45  ;;  %v1218_v47 = vpop.f32.mrb[42].mxu1  ;;  %1259 = vmatprep.mubr.bf16.mxu0 %v702_v42 }
 0x1f2   :  { %v641_v48 = vadd.f32 %v1218_v47, %v1525_v59  ;;  %v632_v49 = vpop.f32.mrb[43].mxu1  ;;  %1260 = vmatmul.mubr.bf16.gmra.mrb[36].mxu0 %v703_v41  ;;  %v686_v51 = vmax.f32 %v638_v44, 0.0 }
 0x1f3   :  { %v633_v50 = vadd.f32 %v1525_v59, %v632_v49  ;;  %v684_v53 = vmax.f32 %v630_v46, 0.0 }
 0x1f4   :  { %v687_v52 = vmax.f32 %v641_v48, 0.0 }
 0x1f5   :  { %v685_v54 = vmax.f32 %v633_v50, 0.0 }
 0x1f6   :  { %v705_v55 = vpack.c.bf16 %v687_v52, %v686_v51 }
 0x1f7   :  { %v704_v56 = vpack.c.bf16 %v685_v54, %v684_v53  ;;  %v1221_v57 = vpop.f32.mrb[44].mxu1 }
 0x1f8   :  { %v654_v58 = vadd.f32 %v1221_v57, %v1525_v59  ;;  %v645_v60 = vpop.f32.mrb[45].mxu1 }
 0x1f9   :  { %v646_v61 = vadd.f32 %v1525_v59, %v645_v60  ;;  %v1222_v63 = vpop.f32.mrb[46].mxu1  ;;  %1263 = vmatprep.mubr.bf16.mxu0 %v704_v56 }
 0x1fa   :  { %v657_v0 = vadd.f32 %v1222_v63, %v1525_v59  ;;  %v648_v1 = vpop.f32.mrb[47].mxu1  ;;  %1264 = vmatmul.mubr.bf16.gmra.mrb[40].mxu0 %v705_v55  ;;  %v690_v3 = vmax.f32 %v654_v58, 0.0 }
 0x1fb   :  { %v649_v2 = vadd.f32 %v1525_v59, %v648_v1  ;;  %v688_v5 = vmax.f32 %v646_v61, 0.0 }
 0x1fc   :  { %v691_v4 = vmax.f32 %v657_v0, 0.0 }
 0x1fd   :  { %v689_v6 = vmax.f32 %v649_v2, 0.0 }
 0x1fe   :  { %v707_v7 = vpack.c.bf16 %v691_v4, %v690_v3 }
 0x1ff   :  { %v706_v8 = vpack.c.bf16 %v689_v6, %v688_v5 }
 0x201   :  { %1267 = vmatprep.mubr.bf16.mxu0 %v706_v8 }
 0x202   :  { %1268 = vmatmul.mubr.bf16.gmra.mrb[44].mxu0 %v707_v7 }
 0x29d   :  { %v1241_v10 = vpop.f32.mrb[16].mxu0 }
 0x29e   :  { %v813_v11 = vpop.f32.mrb[17].mxu0 }
 0x29f   :  { %v814_v12 = vadd.f32 %v1061_v9, %v813_v11  ;;  %v1242_v13 = vpop.f32.mrb[18].mxu0 }
 0x2a0   :  { %v816_v14 = vpop.f32.mrb[19].mxu0 }
 0x2a1   :  { %1004 = vst [vmem:[%s1575_s7] sm:$0xff] %v814_v12  ;;  %v817_v59 = vadd.f32 %v1061_v9, %v816_v14 }
 0x2a3   :  { %1006 = vst [vmem:[%s1575_s7 + $0x8] sm:$0xff] %v817_v59 }
 0x2a5   :  { %v1245_v15 = vpop.f32.mrb[20].mxu0 }
 0x2a6   :  { %v829_v16 = vpop.f32.mrb[21].mxu0 }
 0x2a7   :  { %v1246_v17 = vpop.f32.mrb[22].mxu0 }
 0x2a8   :  { %v832_v18 = vpop.f32.mrb[23].mxu0 }
 0x2ad   :  { %v1249_v19 = vpop.f32.mrb[24].mxu0 }
 0x2ae   :  { %v845_v20 = vpop.f32.mrb[25].mxu0 }
 0x2af   :  { %v1250_v33 = vpop.f32.mrb[26].mxu0 }
 0x2b0   :  { %v848_v62 = vpop.f32.mrb[27].mxu0 }
 0x2b5   :  { %v1253_v21 = vpop.f32.mrb[28].mxu0 }
 0x2b6   :  { %v861_v22 = vpop.f32.mrb[29].mxu0 }
 0x2b7   :  { %v1254_v23 = vpop.f32.mrb[30].mxu0 }
 0x2b8   :  { %v864_v24 = vpop.f32.mrb[31].mxu0 }
 0x2bd   :  { %v1257_v25 = vpop.f32.mrb[32].mxu0 }
 0x2be   :  { %v877_v26 = vpop.f32.mrb[33].mxu0 }
 0x2bf   :  { %v1258_v27 = vpop.f32.mrb[34].mxu0 }
 0x2c0   :  { %v880_v28 = vpop.f32.mrb[35].mxu0 }
 0x2c5   :  { %v1261_v29 = vpop.f32.mrb[36].mxu0 }
 0x2c6   :  { %v893_v30 = vpop.f32.mrb[37].mxu0 }
 0x2c7   :  { %v1262_v31 = vpop.f32.mrb[38].mxu0 }
 0x2c8   :  { %v896_v32 = vpop.f32.mrb[39].mxu0 }
 0x2cd   :  { %v1265_v34 = vpop.f32.mrb[40].mxu0 }
 0x2ce   :  { %v909_v35 = vpop.f32.mrb[41].mxu0 }
 0x2cf   :  { %v1266_v36 = vpop.f32.mrb[42].mxu0 }
 0x2d0   :  { %v912_v37 = vpop.f32.mrb[43].mxu0 }
 0x2d5   :  { %v1269_v38 = vpop.f32.mrb[44].mxu0 }
 0x2d6   :  { %v925_v39 = vpop.f32.mrb[45].mxu0 }
 0x2d7   :  { %v1270_v40 = vpop.f32.mrb[46].mxu0 }
 0x2d8   :  { %v928_v41 = vpop.f32.mrb[47].mxu0 }

</bundles_post_ra>
